<compile_context>
chip_gen: v5e
topology: v5e:2x2
jax: 0.10.0
libtpu: 0.0.40
codegen_flags: <defaults>
</compile_context>

<pallas_src>
import functools

import jax
import jax.numpy as jnp
from jax.experimental import pallas as pl
from jax.experimental.pallas import tpu as pltpu


def _layernorm_kernel(x_ref, g_ref, b_ref, o_ref, *, eps):
    # x_ref: (row_tile, d_model) block in VMEM; reduction is over the lane axis.
    x = x_ref[...].astype(jnp.float32)
    g = g_ref[...].astype(jnp.float32)          # (1, d_model), hoisted once
    b = b_ref[...].astype(jnp.float32)          # (1, d_model), hoisted once

    n = x.shape[-1]
    mean = jnp.mean(x, axis=-1, keepdims=True)
    diff = x - mean
    # torch.std default is unbiased (Bessel correction, / (n - 1))
    var = jnp.sum(diff * diff, axis=-1, keepdims=True) / jnp.float32(n - 1)
    std = jnp.sqrt(var)
    # Per-row reciprocal (exact) instead of a full (row_tile, d_model) divide.
    inv = pl.reciprocal(std + jnp.float32(eps))           # (row_tile, 1)
    out = (diff * inv) * g + b
    o_ref[...] = out.astype(o_ref.dtype)


def _round_up(x, m):
    return ((x + m - 1) // m) * m


def _pick_row_tile(rows, d_model, itemsize):
    """Largest row tile whose double-buffered in+out footprint fits a VMEM budget."""
    try:
        vmem_cap = pltpu.get_tpu_info().vmem_capacity_bytes
    except Exception:
        vmem_cap = 64 * 1024 * 1024   # conservative: v7x per-TensorCore VMEM
    budget = int(0.4 * vmem_cap)      # leave headroom for params / compiler scratch
    # 2 arrays (in + out) x 2 pipeline buffers each
    per_row_bytes = 4 * d_model * itemsize
    row_tile = max(8, budget // per_row_bytes)
    row_tile = min(row_tile, 1024)                       # diminishing returns beyond this
    row_tile = min(row_tile, _round_up(rows, 8))         # don't over-pad tiny inputs
    row_tile = max(8, (row_tile // 8) * 8)               # sublane-aligned
    vmem_limit = min(vmem_cap, max(32 << 20, 4 * row_tile * d_model * itemsize + (8 << 20)))
    return row_tile, int(vmem_limit)


def layer_norm(x, gamma, beta, eps=1e-12, row_tile=None):
    """x: (..., d_model); gamma/beta: (d_model,). Returns same shape/dtype as x."""
    orig_shape = x.shape
    d_model = orig_shape[-1]
    x2 = x.reshape(-1, d_model)
    rows = x2.shape[0]
    itemsize = jnp.dtype(x.dtype).itemsize

    auto_tile, vmem_limit = _pick_row_tile(rows, d_model, itemsize)
    if row_tile is None:
        row_tile = auto_tile

    # Pad rows up to a multiple of row_tile (padded rows are all-zero: they
    # produce finite outputs and are sliced off afterwards).
    padded_rows = _round_up(rows, row_tile)
    if padded_rows != rows:
        x2 = jnp.pad(x2, ((0, padded_rows - rows), (0, 0)))

    gamma2 = gamma.reshape(1, d_model)
    beta2 = beta.reshape(1, d_model)

    # TODO(synk): for d_model not a multiple of 128 the output stores are
    # lane-masked (vst.msk); padding the lane axis would require masking the
    # reduction, so it is left as-is (no-op for typical transformer d_model).

    out = pl.pallas_call(
        functools.partial(_layernorm_kernel, eps=eps),
        out_shape=jax.ShapeDtypeStruct((padded_rows, d_model), x.dtype),
        grid_spec=pltpu.PrefetchScalarGridSpec(
            num_scalar_prefetch=0,
            grid=(padded_rows // row_tile,),
            in_specs=[
                pl.BlockSpec((row_tile, d_model), lambda i: (i, 0)),
                pl.BlockSpec((1, d_model), lambda i: (0, 0)),
                pl.BlockSpec((1, d_model), lambda i: (0, 0)),
            ],
            out_specs=pl.BlockSpec((row_tile, d_model), lambda i: (i, 0)),
        ),
        compiler_params=pltpu.CompilerParams(
            dimension_semantics=("parallel",),
            vmem_limit_bytes=vmem_limit,
        ),
    )(x2, gamma2, beta2)

    if padded_rows != rows:
        out = out[:rows]
    return out.reshape(orig_shape)


if __name__ == "__main__":
    key = jax.random.PRNGKey(0)
    batch, seq, d_model = 2, 8, 32
    x = jax.random.normal(key, (batch, seq, d_model), dtype=jnp.float32)

    # Deterministic parameter init, matching nn.Parameter(torch.ones/zeros(d_model))
    gamma = jnp.ones((d_model,), dtype=jnp.float32)
    beta = jnp.zeros((d_model,), dtype=jnp.float32)
    eps = 1e-12

    out = layer_norm(x, gamma, beta, eps=eps)
    out = jax.block_until_ready(out)

    # Pure-JAX reference (matches the PyTorch module's forward exactly)
    mean = jnp.mean(x, axis=-1, keepdims=True)
    var = jnp.sum((x - mean) ** 2, axis=-1, keepdims=True) / (d_model - 1)
    std = jnp.sqrt(var)
    ref = gamma * (x - mean) / (std + eps) + beta

    assert out.shape == x.shape and out.dtype == x.dtype
    assert jnp.allclose(out, ref, atol=1e-5, rtol=1e-5), "mismatch vs reference"
    print("KERNEL_OK")
</pallas_src>

<mosaic_0001>
module attributes {stable_mosaic.version = 11 : i64} {
  func.func @_layernorm_kernel(%arg0: i32, %arg1: memref<16x32xf32, #tpu.memory_space<vmem>>, %arg2: memref<1x32xf32, #tpu.memory_space<vmem>>, %arg3: memref<1x32xf32, #tpu.memory_space<vmem>>, %arg4: memref<16x32xf32, #tpu.memory_space<vmem>>) attributes {dimension_semantics = [#tpu.dimension_semantics<parallel>], iteration_bounds = array<i64: 1>, scalar_prefetch = 0 : i64, scratch_operands = 0 : i64, tpu.core_type = #tpu.core_type<tc>, window_params = [{transform_indices = @transform_0, window_bounds = array<i64: 16, 32>}, {pipeline_mode = #tpu.pipeline_mode<synchronous>, transform_indices = @transform_1, window_bounds = array<i64: 1, 32>}, {pipeline_mode = #tpu.pipeline_mode<synchronous>, transform_indices = @transform_2, window_bounds = array<i64: 1, 32>}, {transform_indices = @transform_3, window_bounds = array<i64: 16, 32>}]} {
    %c0 = arith.constant 0 : index
    %c0_0 = arith.constant 0 : index
    %0 = vector.load %arg1[%c0, %c0_0] : memref<16x32xf32, #tpu.memory_space<vmem>>, vector<16x32xf32>
    %c0_1 = arith.constant 0 : index
    %c0_2 = arith.constant 0 : index
    %1 = vector.load %arg2[%c0_1, %c0_2] : memref<1x32xf32, #tpu.memory_space<vmem>>, vector<1x32xf32>
    %c0_3 = arith.constant 0 : index
    %c0_4 = arith.constant 0 : index
    %2 = vector.load %arg3[%c0_3, %c0_4] : memref<1x32xf32, #tpu.memory_space<vmem>>, vector<1x32xf32>
    %cst = arith.constant dense<0.000000e+00> : vector<16xf32>
    %3 = vector.multi_reduction <add>, %0, %cst [1] : vector<16x32xf32> to vector<16xf32>
    %4 = vector.shape_cast %3 : vector<16xf32> to vector<16x1xf32>
    %cst_5 = arith.constant 3.200000e+01 : f32
    %5 = vector.broadcast %cst_5 : f32 to vector<16x1xf32>
    %6 = arith.divf %4, %5 : vector<16x1xf32>
    %7 = vector.broadcast %6 : vector<16x1xf32> to vector<16x32xf32>
    %8 = arith.subf %0, %7 : vector<16x32xf32>
    %9 = arith.mulf %8, %8 : vector<16x32xf32>
    %cst_6 = arith.constant dense<0.000000e+00> : vector<16xf32>
    %10 = vector.multi_reduction <add>, %9, %cst_6 [1] : vector<16x32xf32> to vector<16xf32>
    %11 = vector.shape_cast %10 : vector<16xf32> to vector<16x1xf32>
    %cst_7 = arith.constant 3.100000e+01 : f32
    %12 = vector.broadcast %cst_7 : f32 to vector<16x1xf32>
    %13 = arith.divf %11, %12 : vector<16x1xf32>
    %14 = math.sqrt %13 : vector<16x1xf32>
    %cst_8 = arith.constant 9.99999996E-13 : f32
    %15 = vector.broadcast %cst_8 : f32 to vector<16x1xf32>
    %16 = arith.addf %14, %15 : vector<16x1xf32>
    %17 = tpu.reciprocal %16 : vector<16x1xf32> -> vector<16x1xf32>
    %18 = vector.broadcast %17 : vector<16x1xf32> to vector<16x32xf32>
    %19 = arith.mulf %8, %18 : vector<16x32xf32>
    %20 = vector.broadcast %1 : vector<1x32xf32> to vector<16x32xf32>
    %21 = arith.mulf %19, %20 : vector<16x32xf32>
    %22 = vector.broadcast %2 : vector<1x32xf32> to vector<16x32xf32>
    %23 = arith.addf %21, %22 : vector<16x32xf32>
    %c0_9 = arith.constant 0 : index
    %c0_10 = arith.constant 0 : index
    %24 = vector.load %arg4[%c0_9, %c0_10] : memref<16x32xf32, #tpu.memory_space<vmem>>, vector<16x32xf32>
    tpu.vector_store %arg4[%c0_9, %c0_10], %23 {strides = array<i32>} : memref<16x32xf32, #tpu.memory_space<vmem>>, vector<16x32xf32>,
    return
  }
  func.func @transform_0(%arg0: i32) -> (i32, i32) {
    %c0_i32 = arith.constant 0 : i32
    %c0_i32_0 = arith.constant 0 : i32
    return %arg0, %c0_i32 : i32, i32
  }
  func.func @transform_1(%arg0: i32) -> (i32, i32) {
    %c0_i32 = arith.constant 0 : i32
    %c0_i32_0 = arith.constant 0 : i32
    %c0_i32_1 = arith.constant 0 : i32
    return %c0_i32, %c0_i32_0 : i32, i32
  }
  func.func @transform_2(%arg0: i32) -> (i32, i32) {
    %c0_i32 = arith.constant 0 : i32
    %c0_i32_0 = arith.constant 0 : i32
    %c0_i32_1 = arith.constant 0 : i32
    return %c0_i32, %c0_i32_0 : i32, i32
  }
  func.func @transform_3(%arg0: i32) -> (i32, i32) {
    %c0_i32 = arith.constant 0 : i32
    %c0_i32_0 = arith.constant 0 : i32
    return %arg0, %c0_i32 : i32, i32
  }
}

</mosaic_0001>

<bundles_post_ra>
// kernel: tpu_custom_call.1
= control target key start
LH: loop header
LB: loop body
LE: loop exit
PB: predicated region body
PF: predicated region fallthrough
CT: control target
= control target key end

     0   :  { %8 = vsyncpa [#allocation3], 0  ;;  %s332_s0 = inlined_call_operand.hbm [shape: f32[16,32], index: 0, kind: input, shape index: {}]   ;;  %s333_s1 = inlined_call_operand.hbm [shape: f32[1,32], index: 1, kind: input, shape index: {}]   ;;  %s334_s2 = inlined_call_operand.vmem [shape: f32[1,32], index: 2, kind: input, shape index: {}]   ;;  %s335_s3 = inlined_call_operand.hbm [shape: f32[16,32], index: 3, kind: output, shape index: {}]  }
   0x1   :  { %9 = vsyncpa [#allocation6], 0 }
   0x2   :  { %10 = vsyncpa [#allocation4], 0  ;;  %s15_s14 = sshll.u32 %s332_s0, 4  ;;  %s271_s15 = smov [#allocation2]   ;;  %s16_s14 = int_to_ptr.hbm [resolvable:$true] %s15_s14 }
   0x3   :  { %s17_s16 = sshll.u32 %s271_s15, 4  ;;  %s29_s19 = sshll.u32 %s333_s1, 4  ;;  %s18_s16 = int_to_ptr.vmem [resolvable:$true] %s17_s16  ;;  %s30_s19 = int_to_ptr.hbm [resolvable:$true] %s29_s19 }
   0x4   :  { %s272_s20 = smov 128   ;;  %s273_s21 = smov 8  }
   0x5   :  { %23 = dma.hbm_to_vmem [thread:$0]  %s16_s14, 256, %s18_s16, [#allocation3], %s272_s20, %s272_s20, %s273_s21  }
   0x6   :  { %s274_s22 = smov [#allocation5]  }
   0x7   :  { %s31_s23 = sshll.u32 %s274_s22, 4  ;;  %s32_s23 = int_to_ptr.vmem [resolvable:$true] %s31_s23 }
   0x8   :  { %34 = dma.hbm_to_vmem [thread:$0]  %s30_s19, 16, %s32_s23, [#allocation6]  }
   0x9   :  { %265 = dma.done.wait [#allocation3], 256  }
   0xa   :  { %266 = vsyncadd [#allocation3], 4294967040 }
   0xb   :  { %267 = dma.done.wait [#allocation6], 16  }
   0xc   :  { %268 = vsyncadd [#allocation6], 4294967280  ;;  %vm49_vm0 = vcmask 261120   ;;  %v45_v0 = vld [vmem:[#allocation2] sm:$0xff]  ;;  %v46_v2 = vld [vmem:[#allocation2 + $0x8] sm:$0xff]  ;;  %v275_v4 = vmov 32.0  }
   0xd   :  { %v50_v1 = vsel %vm49_vm0, %v45_v0, 0.0  ;;  %v53_v3 = vsel %vm49_vm0, %v46_v2, 0.0  ;;  %181 = vrcp.f32 %v275_v4  ;;  %v276_v21 = vmov 31.0   ;;  %s277_s24 = smov [#allocation7]   ;;  %s158_s27 = sshll.u32 %s335_s3, 4  ;;  %s159_s27 = int_to_ptr.hbm [resolvable:$true] %s158_s27 }
   0xe   :  { %51 = vadd.xlane.f32.xlu0 %v50_v1  ;;  %183 = vrcp.f32 %v276_v21  ;;  %v179_v1 = vld [vmem:[#allocation5] ss:$0 sm:$0xff]  ;;  %s156_s25 = sshll.u32 %s277_s24, 4  ;;  %s157_s25 = int_to_ptr.vmem [resolvable:$true] %s156_s25 }
  0x13   :  { %v182_v5 = vpop.eup %181 }
  0x14   :  { %v57_v6 = vmul.f32 32.0, %v182_v5  ;;  %vm61_vm1 = vweird.f32 %v182_v5  ;;  %v184_v22 = vpop.eup %183 }
  0x15   :  { %v76_v23 = vmul.f32 31.0, %v184_v22  ;;  %vm80_vm2 = vweird.f32 %v184_v22 }
  0x16   :  { %54 = vadd.xlane.f32.xlu0 %v53_v3  ;;  %v58_v7 = vsub.f32 1.0, %v57_v6 }
  0x17   :  { %v77_v24 = vsub.f32 1.0, %v76_v23 }
  0x18   :  { %v59_v8 = vmul.f32 %v182_v5, %v58_v7 }
  0x19   :  { %v78_v25 = vmul.f32 %v184_v22, %v77_v24 }
  0x1a   :  { %v60_v9 = vadd.f32 %v182_v5, %v59_v8 }
  0x1b   :  { %v79_v26 = vadd.f32 %v184_v22, %v78_v25 }
  0x1c   :  { %v62_v10 = vsel %vm61_vm1, %v182_v5, %v60_v9  ;;  %v180_v5 = vld [vmem:[%s334_s2] ss:$0 sm:$0xff] }
  0x1d   :  { %v81_v27 = vsel %vm80_vm2, %v184_v22, %v79_v26 }
  0x81   :  { %v52_v11 = vpop.xlane.xlu0 %51 }
  0x82   :  { %v63_v12 = vmul.f32 %v62_v10, %v52_v11 }
  0x84   :  { %v309_v13 = vsub.f32 %v45_v0, %v63_v12 }
  0x86   :  { %v67_v14 = vmul.f32 %v309_v13, %v309_v13 }
  0x88   :  { %v69_v15 = vsel %vm49_vm0, %v67_v14, 0.0 }
  0x89   :  { %70 = vadd.xlane.f32.xlu1 %v69_v15  ;;  %v55_v16 = vpop.xlane.xlu0 %54 }
  0x8a   :  { %v64_v17 = vmul.f32 %v62_v10, %v55_v16 }
  0x8c   :  { %v314_v18 = vsub.f32 %v46_v2, %v64_v17 }
  0x8e   :  { %v68_v19 = vmul.f32 %v314_v18, %v314_v18 }
  0x90   :  { %v72_v20 = vsel %vm49_vm0, %v68_v19, 0.0 }
  0x91   :  { %73 = vadd.xlane.f32.xlu1 %v72_v20 }
  0xfc   :  { %v71_v28 = vpop.xlane.xlu1 %70 }
  0xfd   :  { %v82_v29 = vmul.f32 %v81_v27, %v71_v28 }
  0xff   :  { %185 = vrsqrt.f32 %v82_v29  ;;  %vm91_vm3 = vcmp.eq.f32.partialorder %v82_v29, inf  ;;  %v94_v42 = vand.u32 2147483648, %v82_v29  ;;  %vm93_vm4 = vcmp.eq.f32.partialorder %v82_v29, 0.0 }
 0x104   :  { %v74_v30 = vpop.xlane.xlu1 %73 }
 0x105   :  { %v186_v31 = vpop.eup %185  ;;  %v83_v32 = vmul.f32 %v81_v27, %v74_v30 }
 0x106   :  { %v85_v33 = vmul.f32 %v186_v31, %v82_v29 }
 0x107   :  { %187 = vrsqrt.f32 %v83_v32  ;;  %vm103_vm5 = vcmp.eq.f32.partialorder %v83_v32, inf  ;;  %v106_v50 = vand.u32 2147483648, %v83_v32  ;;  %vm105_vm6 = vcmp.eq.f32.partialorder %v83_v32, 0.0 }
 0x108   :  { %v86_v34 = vmul.f32 %v186_v31, %v85_v33 }
 0x10a   :  { %v87_v35 = vmul.f32 0.5, %v86_v34 }
 0x10c   :  { %v88_v36 = vsub.f32 1.5, %v87_v35 }
 0x10d   :  { %v188_v37 = vpop.eup %187 }
 0x10e   :  { %v89_v38 = vmul.f32 %v186_v31, %v88_v36  ;;  %v97_v39 = vmul.f32 %v188_v37, %v83_v32 }
 0x110   :  { %v90_v40 = vmul.f32 %v89_v38, %v82_v29  ;;  %v98_v41 = vmul.f32 %v188_v37, %v97_v39 }
 0x112   :  { %v92_v43 = vsel %vm91_vm3, %v82_v29, %v90_v40  ;;  %v99_v44 = vmul.f32 0.5, %v98_v41 }
 0x113   :  { %v95_v45 = vsel %vm93_vm4, %v94_v42, %v92_v43 }
 0x114   :  { %v108_v46 = vadd.f32 1e-12, %v95_v45  ;;  %v100_v47 = vsub.f32 1.5, %v99_v44 }
 0x116   :  { %189 = vrcp.f32 %v108_v46  ;;  %v101_v48 = vmul.f32 %v188_v37, %v100_v47  ;;  %v121_v57 = vand.u32 2147483648, %v108_v46  ;;  %v119_v59 = vand.u32 2147483647, %v108_v46 }
 0x117   :  { %vm115_vm8 = vweird.f32 %v108_v46 }
 0x118   :  { %v102_v49 = vmul.f32 %v101_v48, %v83_v32  ;;  %v122_v62 = vor.u32 1.1754944e-38, %v121_v57  ;;  %vm120_vm10 = vcmp.eq.f32.partialorder %v119_v59, 8.507059e+37 }
 0x11a   :  { %v104_v51 = vsel %vm103_vm5, %v83_v32, %v102_v49 }
 0x11b   :  { %v107_v52 = vsel %vm105_vm6, %v106_v50, %v104_v51 }
 0x11c   :  { %v190_v53 = vpop.eup %189  ;;  %v109_v54 = vadd.f32 1e-12, %v107_v52 }
 0x11d   :  { %v111_v55 = vmul.f32 %v190_v53, %v108_v46  ;;  %vm116_vm7 = vweird.f32 %v190_v53 }
 0x11e   :  { %191 = vrcp.f32 %v109_v54  ;;  %vm117_vm9 = vmor %vm115_vm8, %vm116_vm7  ;;  %v135_v6 = vand.u32 2147483648, %v109_v54  ;;  %v133_v8 = vand.u32 2147483647, %v109_v54  ;;  %vm129_vm12 = vweird.f32 %v109_v54 }
 0x11f   :  { %v112_v56 = vsub.f32 1.0, %v111_v55 }
 0x120   :  { %v136_v12 = vor.u32 1.1754944e-38, %v135_v6  ;;  %vm134_vm14 = vcmp.eq.f32.partialorder %v133_v8, 8.507059e+37 }
 0x121   :  { %v113_v58 = vmul.f32 %v190_v53, %v112_v56 }
 0x123   :  { %v114_v60 = vadd.f32 %v190_v53, %v113_v58 }
 0x124   :  { %v192_v61 = vpop.eup %191 }
 0x125   :  { %v118_v63 = vsel %vm117_vm9, %v190_v53, %v114_v60  ;;  %v125_v0 = vmul.f32 %v192_v61, %v109_v54  ;;  %vm130_vm11 = vweird.f32 %v192_v61 }
 0x126   :  { %v123_v2 = vsel %vm120_vm10, %v122_v62, %v118_v63  ;;  %vm131_vm13 = vmor %vm129_vm12, %vm130_vm11 }
 0x127   :  { %v126_v3 = vsub.f32 1.0, %v125_v0  ;;  %v138_v4 = vmul.f32 %v123_v2, %v309_v13 }
 0x129   :  { %v127_v7 = vmul.f32 %v192_v61, %v126_v3  ;;  %v143_v9 = vmul.f32 %v179_v1, %v138_v4 }
 0x12b   :  { %v128_v10 = vadd.f32 %v192_v61, %v127_v7  ;;  %v148_v11 = vadd.f32 %v180_v5, %v143_v9 }
 0x12d   :  { %v132_v14 = vsel %vm131_vm13, %v192_v61, %v128_v10  ;;  %150 = vst.msk [vmem:[#allocation7] sm:$0xff] %vm49_vm0, %v148_v11 }
 0x12e   :  { %v137_v15 = vsel %vm134_vm14, %v136_v12, %v132_v14 }
 0x12f   :  { %v139_v13 = vmul.f32 %v137_v15, %v314_v18 }
 0x131   :  { %v144_v16 = vmul.f32 %v179_v1, %v139_v13 }
 0x133   :  { %v149_v17 = vadd.f32 %v180_v5, %v144_v16 }
 0x135   :  { %151 = vst.msk [vmem:[#allocation7 + $0x8] sm:$0xff] %vm49_vm0, %v149_v17 }
 0x136   :  { %164 = dma.vmem_to_hbm [thread:$0]  %s157_s25, 256, %s159_s27, [#allocation4], %s272_s20, %s272_s20, %s273_s21  }
 0x137   :  { %269 = dma.done.wait [#allocation4], 256  }
 0x138   :  { %270 = vsyncadd [#allocation4], 4294967040 }
 0x139   :  { %169 = vsyncpa [#allocation3], 1 }
 0x13a   :  { %170 = vsyncpa [#allocation6], 1 }
 0x13b   :  { %171 = vsyncpa [#allocation4], 1 }

</bundles_post_ra>
